<compile_context>
chip_gen: v7x
topology: tpu7x:2x2x1
jax: 0.10.0
libtpu: 0.0.40
codegen_flags: <defaults>
</compile_context>

<pallas_src>
import functools

import jax
import jax.numpy as jnp
from jax.experimental import pallas as pl
from jax.experimental.pallas import tpu as pltpu


# --------------------------------------------------------------------------
# Kernel
# --------------------------------------------------------------------------
def _gap_kernel(x_ref, o_ref, acc_ref, *, inv_hw):
    # x_ref  : (TR, TK)  tile of the (N*C, H*W) slab
    # o_ref  : (TR, 1)   per-row mean (written on the last spatial chunk)
    # acc_ref: (TR, 1)   f32 running sum across spatial chunks
    k = pl.program_id(1)

    @pl.when(k == 0)
    def _init():
        acc_ref[...] = jnp.zeros_like(acc_ref)

    # Accumulate in f32 regardless of the input dtype.
    x = x_ref[...].astype(jnp.float32)
    acc_ref[...] += jnp.sum(x, axis=-1, keepdims=True)

    @pl.when(k == pl.num_programs(1) - 1)
    def _finalize():
        # Multiply by a compile-time constant 1/(H*W) instead of dividing.
        o_ref[...] = (acc_ref[...] * inv_hw).astype(o_ref.dtype)


# --------------------------------------------------------------------------
# Tile selection
# --------------------------------------------------------------------------
def _divisors(n):
    out = set()
    i = 1
    while i * i <= n:
        if n % i == 0:
            out.add(i)
            out.add(n // i)
        i += 1
    return sorted(out)


def _pick_tiles(nc, hw, itemsize, block_bytes):
    """Pick (row_tile, spatial_tile) dividing (nc, hw) exactly, honoring the
    TPU (8, 128) tiling rules and a per-block VMEM budget."""
    # Whole problem fits in a single block -> one grid step, no chunking.
    if nc * hw * itemsize <= block_bytes:
        return nc, hw

    min_rows = nc if nc < 8 else 8

    # Spatial (lane) tile: full H*W if it fits with the minimum row tile,
    # otherwise the largest multiple-of-128 divisor of H*W under budget.
    if min_rows * hw * itemsize <= block_bytes:
        tk = hw
    else:
        cand = [d for d in _divisors(hw)
                if d % 128 == 0 and min_rows * d * itemsize <= block_bytes]
        # Fallback: full H*W (block last dim must be a multiple of 128 or the
        # full dim); may exceed the soft budget but stays correct.
        tk = max(cand) if cand else hw

    # Row (sublane) tile: largest multiple-of-8 divisor of N*C under budget.
    cand_r = [d for d in _divisors(nc)
              if d % 8 == 0 and d * tk * itemsize <= block_bytes]
    # Fallback: full N*C (block second-last dim must be a multiple of 8 or
    # the full dim).
    tr = max(cand_r) if cand_r else nc
    return tr, tk


# --------------------------------------------------------------------------
# Wrapper
# --------------------------------------------------------------------------
def global_avg_pool2d(x, *, block_bytes=2 * 1024 * 1024):
    """x: (N, C, H, W) -> (N, C) global average pool, same dtype as input."""
    n, c, h, w = x.shape
    nc, hw = n * c, h * w

    # Free reshape for a contiguous NCHW array: lane-dense reduction rows.
    x2 = x.reshape(nc, hw)

    tr, tk = _pick_tiles(nc, hw, jnp.dtype(x.dtype).itemsize, block_bytes)
    grid = (nc // tr, hw // tk)
    inv_hw = 1.0 / float(hw)

    out = pl.pallas_call(
        functools.partial(_gap_kernel, inv_hw=inv_hw),
        out_shape=jax.ShapeDtypeStruct((nc, 1), x.dtype),
        grid_spec=pltpu.PrefetchScalarGridSpec(
            num_scalar_prefetch=0,
            grid=grid,
            in_specs=[
                pl.BlockSpec((tr, tk), lambda i, k: (i, k)),
            ],
            out_specs=pl.BlockSpec((tr, 1), lambda i, k: (i, 0)),
            scratch_shapes=[pltpu.VMEM((tr, 1), jnp.float32)],
        ),
        compiler_params=pltpu.CompilerParams(
            # Rows are independent (megacore / 2-TC sharding); the spatial
            # chunk axis is a reduction -> "arbitrary" and last in the grid.
            dimension_semantics=("parallel", "arbitrary"),
        ),
    )(x2)

    return out.reshape(n, c)


# --------------------------------------------------------------------------
# Self-test
# --------------------------------------------------------------------------
if __name__ == "__main__":
    key = jax.random.PRNGKey(0)

    # Small shape consistent with the module's forward: NCHW.
    N, C, H, W = 2, 4, 16, 16
    x = jax.random.normal(key, (N, C, H, W), dtype=jnp.float32)

    out = global_avg_pool2d(x)
    out = jax.block_until_ready(out)

    ref = jnp.mean(x, axis=(2, 3))
    assert out.shape == (N, C), out.shape
    assert jnp.allclose(out, ref, atol=1e-5, rtol=1e-5), "mismatch vs reference"

    # Exercise the chunked/tiled path (multi-step grid over rows and H*W)
    # by forcing a tiny per-block VMEM budget on a slightly larger input.
    key2 = jax.random.PRNGKey(1)
    x2 = jax.random.normal(key2, (2, 8, 32, 32), dtype=jnp.float32)
    out2 = jax.block_until_ready(global_avg_pool2d(x2, block_bytes=4096))
    ref2 = jnp.mean(x2, axis=(2, 3))
    assert jnp.allclose(out2, ref2, atol=1e-5, rtol=1e-5), "mismatch (chunked)"

    print("KERNEL_OK")
</pallas_src>

<mosaic_0001>
module attributes {stable_mosaic.version = 11 : i64} {
  func.func @_gap_kernel(%arg0: i32, %arg1: i32, %arg2: memref<8x256xf32, #tpu.memory_space<vmem>>, %arg3: memref<8x1xf32, #tpu.memory_space<vmem>>, %arg4: memref<8x1xf32, #tpu.memory_space<vmem>>) attributes {dimension_semantics = [#tpu.dimension_semantics<parallel>, #tpu.dimension_semantics<arbitrary>], iteration_bounds = array<i64: 1, 1>, scalar_prefetch = 0 : i64, scratch_operands = 1 : i64, tpu.core_type = #tpu.core_type<tc>, window_params = [{transform_indices = @transform_0, window_bounds = array<i64: 8, 256>}, {transform_indices = @transform_1, window_bounds = array<i64: 8, 1>}]} {
    %c0_i32 = arith.constant 0 : i32
    %0 = arith.cmpi eq, %arg1, %c0_i32 : i32
    %1 = arith.extui %0 : i1 to i32
    %c0_i32_0 = arith.constant 0 : i32
    %2 = arith.cmpi ne, %1, %c0_i32_0 : i32
    scf.if %2 {
      %cst_8 = arith.constant 0.000000e+00 : f32
      %12 = vector.broadcast %cst_8 : f32 to vector<8x1xf32>
      %c0_9 = arith.constant 0 : index
      %c0_10 = arith.constant 0 : index
      %13 = vector.load %arg4[%c0_9, %c0_10] : memref<8x1xf32, #tpu.memory_space<vmem>>, vector<8x1xf32>
      tpu.vector_store %arg4[%c0_9, %c0_10], %12 {strides = array<i32>} : memref<8x1xf32, #tpu.memory_space<vmem>>, vector<8x1xf32>,
    } else {
    }
    %c0 = arith.constant 0 : index
    %c0_1 = arith.constant 0 : index
    %3 = vector.load %arg2[%c0, %c0_1] : memref<8x256xf32, #tpu.memory_space<vmem>>, vector<8x256xf32>
    %c0_2 = arith.constant 0 : index
    %c0_3 = arith.constant 0 : index
    %4 = vector.load %arg4[%c0_2, %c0_3] : memref<8x1xf32, #tpu.memory_space<vmem>>, vector<8x1xf32>
    %cst = arith.constant dense<0.000000e+00> : vector<8xf32>
    %5 = vector.multi_reduction <add>, %3, %cst [1] : vector<8x256xf32> to vector<8xf32>
    %6 = vector.shape_cast %5 : vector<8xf32> to vector<8x1xf32>
    %7 = arith.addf %4, %6 : vector<8x1xf32>
    %c0_4 = arith.constant 0 : index
    %c0_5 = arith.constant 0 : index
    %8 = vector.load %arg4[%c0_4, %c0_5] : memref<8x1xf32, #tpu.memory_space<vmem>>, vector<8x1xf32>
    tpu.vector_store %arg4[%c0_4, %c0_5], %7 {strides = array<i32>} : memref<8x1xf32, #tpu.memory_space<vmem>>, vector<8x1xf32>,
    %c0_i32_6 = arith.constant 0 : i32
    %9 = arith.cmpi eq, %arg1, %c0_i32_6 : i32
    %10 = arith.extui %9 : i1 to i32
    %c0_i32_7 = arith.constant 0 : i32
    %11 = arith.cmpi ne, %10, %c0_i32_7 : i32
    scf.if %11 {
      %c0_8 = arith.constant 0 : index
      %c0_9 = arith.constant 0 : index
      %12 = vector.load %arg4[%c0_8, %c0_9] : memref<8x1xf32, #tpu.memory_space<vmem>>, vector<8x1xf32>
      %cst_10 = arith.constant 3.906250e-03 : f32
      %13 = vector.broadcast %cst_10 : f32 to vector<8x1xf32>
      %14 = arith.mulf %12, %13 : vector<8x1xf32>
      %c0_11 = arith.constant 0 : index
      %c0_12 = arith.constant 0 : index
      %15 = vector.load %arg3[%c0_11, %c0_12] : memref<8x1xf32, #tpu.memory_space<vmem>>, vector<8x1xf32>
      tpu.vector_store %arg3[%c0_11, %c0_12], %14 {strides = array<i32>} : memref<8x1xf32, #tpu.memory_space<vmem>>, vector<8x1xf32>,
    } else {
    }
    return
  }
  func.func @transform_0(%arg0: i32, %arg1: i32) -> (i32, i32) {
    %c0_i32 = arith.constant 0 : i32
    return %arg0, %arg1 : i32, i32
  }
  func.func @transform_1(%arg0: i32, %arg1: i32) -> (i32, i32) {
    %c0_i32 = arith.constant 0 : i32
    %c0_i32_0 = arith.constant 0 : i32
    return %arg0, %c0_i32 : i32, i32
  }
}

</mosaic_0001>

<bundles_post_ra>
// kernel: tpu_custom_call.1
= control target key start
LH: loop header
LB: loop body
LE: loop exit
PB: predicated region body
PF: predicated region fallthrough
CT: control target
= control target key end

     0   :  { %6 = vsyncpa [#allocation4], 0  ;;  %s72_s6 = smov [#allocation3]   ;;  %s99_s0 = inlined_call_operand.hbm [shape: f32[8,256], index: 0, kind: input, shape index: {}]   ;;  %s100_s1 = inlined_call_operand.vmem [shape: f32[8,1], index: 1, kind: output, shape index: {}]  }
   0x1   :  { %s13_s7 = sshll.u32 %s72_s6, 4  ;;  %s48_s10 = scalar_lea.hbm %s99_s0, 256  ;;  %s14_s7 = int_to_ptr.vmem [resolvable:$true] %s13_s7 }
   0x2   :  { %p49_p0 = scmp.ne.s32.totalorder %s99_s0, %s48_s10  ;;  %p52_p1 = scmp.lt.u32.totalorder %s48_s10, %s99_s0 }
   0x4   :  { %p54_p2 = pnand %p52_p1, %p49_p0 }
   0x6   :  { %57 = shalt.err (!%p54_p2)
}
   0x7   :  { %s58_s15 = scalar_lea.vmem %s14_s7, 256  ;;  %p63_p4 = scmp.lt.s32.totalorder %s14_s7, %s14_s7 }
   0x8   :  { %p59_p3 = scmp.ne.s32.totalorder %s14_s7, %s58_s15  ;;  %p64_p5 = scmp.lt.s32.totalorder %s58_s15, %s58_s15 }
   0xa   :  { %p65_p6 = por %p64_p5, %p63_p4 }
   0xc   :  { %p66_p7 = pnand %p65_p6, %p59_p3 }
   0xe   :  { %69 = shalt.err (!%p66_p7)
}
   0xf   :  { %16 = dma.hbm_to_vmem [thread:$0]  %s99_s0, 256, %s14_s7, [#allocation4]  }
  0x10   :  { %70 = dma.done.wait [#allocation4], 256  }
  0x11   :  { %71 = vsyncadd [#allocation4], 4294967040  ;;  %vm24_vm0 = vcmask 7168   ;;  %v73_v0 = vmov 0.0   ;;  %v26_v1 = vld [vmem:[#allocation3] sm:$0xff]  ;;  %v27_v2 = vld [vmem:[#allocation3 + $0x8] sm:$0xff] }
  0x12   :  { %25 = vst.msk [vmem:[#allocation2] sm:$0xff] %vm24_vm0, %v73_v0  ;;  %v29_v3 = vadd.f32 %v27_v2, %v26_v1 }
  0x14   :  { %30 = vadd.xlane.f32.xlu0 %v29_v3 }
  0x19   :  { %v28_v4 = vld [vmem:[#allocation2] sm:$0xff] }
  0xa1   :  { %v31_v5 = vpop.xlane.xlu0 %30 }
  0xa2   :  { %v32_v6 = vadd.f32 %v31_v5, %v28_v4 }
  0xa4   :  { %34 = vst.msk [vmem:[#allocation2] sm:$0xff] %vm24_vm0, %v32_v6 }
  0xab   :  { %v38_v7 = vld [vmem:[#allocation2] sm:$0xff] }
  0xac   :  { %v39_v8 = vmul.f32 0.00390625, %v38_v7 }
  0xae   :  { %40 = vst.msk [vmem:[%s100_s1] sm:$0xff] %vm24_vm0, %v39_v8 }
  0xaf   :  { %45 = vsyncpa [#allocation4], 1 }

</bundles_post_ra>
